<compile_context>
chip_gen: v7x
topology: tpu7x:2x2x1
jax: 0.10.0
libtpu: 0.0.40
codegen_flags: <defaults>
</compile_context>

<pallas_src>
import jax
import jax.numpy as jnp
from jax.experimental import pallas as pl
from jax.experimental.pallas import tpu as pltpu

# Constants from ATORpt globalDefs (defined deterministically in-script).
ACTIVATION_MAX_VAL = 10.0
MULT_EMU_OFFSET_VAL = 1.0
MULT_EMU_PRE_MIN_VAL = 1e-9
MULT_EMU_PRE_MAX_VAL = 1e9
MULT_EMU_POST_MAX_VAL = 20.0


def _additive_multiplicative_kernel(x_ref, wa_ref, wm_ref, o_ref):
    """One batch tile of the forward pass (useMultiplicativeUnits=True, no bias).

    x_ref  : (TB, F_in)      input activations (pipelined batch tile)
    wa_ref : (F_in, F_half)  additive weights      (VMEM-resident)
    wm_ref : (F_in, F_half)  multiplicative weights (VMEM-resident)
    o_ref  : (TB, 2*F_half)  output = concat(relu(Za), relu(Zm), axis=1)
    """
    half = wa_ref.shape[1]

    # Elementwise pre-processing in f32 (clip on VPU, log on EUP; safe on v5e).
    x = x_ref[...].astype(jnp.float32)
    a_a = jnp.clip(x, -ACTIVATION_MAX_VAL, ACTIVATION_MAX_VAL)            # clipActivation
    a_m = jnp.log(jnp.clip(a_a + MULT_EMU_OFFSET_VAL,
                           MULT_EMU_PRE_MIN_VAL, MULT_EMU_PRE_MAX_VAL))    # mult. emulation (pre)

    # Two MXU dots, each in its own weight dtype, f32 accumulation.
    za = jnp.dot(a_a.astype(wa_ref.dtype), wa_ref[...],
                 preferred_element_type=jnp.float32)                       # (TB, half)
    zm = jnp.dot(a_m.astype(wm_ref.dtype), wm_ref[...],
                 preferred_element_type=jnp.float32)                       # (TB, half)

    # Multiplicative post-processing only on the Zm half (EUP exp).
    zm = jnp.exp(jnp.clip(zm, -MULT_EMU_POST_MAX_VAL,
                          MULT_EMU_POST_MAX_VAL)) - MULT_EMU_OFFSET_VAL

    aa = jnp.maximum(za, 0.0).astype(o_ref.dtype)
    am = jnp.maximum(zm, 0.0).astype(o_ref.dtype)

    if half % 128 == 0:
        # Both halves are lane-aligned -> two unmasked, lane-dense stores.
        o_ref[:, :half] = aa
        o_ref[:, half:] = am
    else:
        # Small / unaligned half: one concatenated full-tile store.
        o_ref[...] = jnp.concatenate([aa, am], axis=1)


def layer_additive_multiplicative(x, wa, wm, *, tile_b=1024):
    """Forward pass of LayerAdditiveMultiplicativeClass
    (useMultiplicativeUnits=True, useBias=False).

    x : (B, F_in), wa/wm : (F_in, F_out//2) -> out (B, F_out).
    """
    B, F_in = x.shape
    F_half = wa.shape[1]
    F_out = 2 * F_half
    assert wa.shape == (F_in, F_half) and wm.shape == (F_in, F_half)

    x_itemsize = jnp.dtype(x.dtype).itemsize
    out_dtype = x.dtype
    o_itemsize = jnp.dtype(out_dtype).itemsize

    # Sublane packing factor of the input dtype (f32:8, bf16:16, int8/fp8:32).
    pack = {4: 8, 2: 16, 1: 32}.get(x_itemsize, 8)

    def _round_up(v, m):
        return ((v + m - 1) // m) * m

    # Batch tile: as large as requested (HBM-bound layer), rounded to the
    # sublane packing, capped so the grid keeps multiple tiles when B allows
    # (v7x 2-TC sharding via "parallel" semantics + pipeline overlap).
    tb = _round_up(max(pack, min(tile_b, B)), pack)
    if B >= 4 * pack:
        min_tiles = 4
    elif B >= 2 * pack:
        min_tiles = 2
    else:
        min_tiles = 1
    if min_tiles > 1:
        tb = min(tb, _round_up(pl.cdiv(B, min_tiles), pack))
    grid = (pl.cdiv(B, tb),)   # ragged last tile: OOB rows masked on writeback

    # VMEM footprint -> scoped limit (don't request the whole 64 MiB of v7x).
    w_bytes = (wa.size * jnp.dtype(wa.dtype).itemsize
               + wm.size * jnp.dtype(wm.dtype).itemsize)
    footprint = (2 * tb * F_in * x_itemsize          # double-buffered x tiles
                 + 2 * tb * F_out * o_itemsize       # double-buffered out tiles
                 + 2 * w_bytes                       # resident weights (default 2-buffered)
                 + 4 * tb * (F_in + F_out) * 4)      # f32 elementwise intermediates headroom
    # TODO(synk): pipeline_mode=pl.Buffered(1) on the constant-index weight specs
    # would halve the resident-weight VMEM for large F; left at default buffering.
    vmem_limit = int(min(max(footprint + (8 << 20), 16 << 20), 128 << 20))

    cost = pl.CostEstimate(
        flops=2 * B * F_in * F_out,                  # useful MACs only (two half-matmuls)
        transcendentals=B * (F_in + F_half),         # log on inputs + exp on Zm
        bytes_accessed=(x.size * x_itemsize + w_bytes + B * F_out * o_itemsize),
    )

    out = pl.pallas_call(
        _additive_multiplicative_kernel,
        out_shape=jax.ShapeDtypeStruct((B, F_out), out_dtype),
        grid_spec=pl.GridSpec(
            grid=grid,
            in_specs=[
                pl.BlockSpec((tb, F_in), lambda i: (i, 0)),       # pipelined x tiles
                pl.BlockSpec((F_in, F_half), lambda i: (0, 0)),   # resident Wa
                pl.BlockSpec((F_in, F_half), lambda i: (0, 0)),   # resident Wm
            ],
            out_specs=pl.BlockSpec((tb, F_out), lambda i: (i, 0)),
        ),
        compiler_params=pltpu.CompilerParams(
            dimension_semantics=("parallel",),       # batch tiles independent
            vmem_limit_bytes=vmem_limit,
        ),
        cost_estimate=cost,
    )(x, wa, wm)
    return out


def _reference_forward(x, wa, wm):
    """Pure-JAX reference mirroring the PyTorch forward
    (useMultiplicativeUnits=True, useBias=False)."""
    a_a = jnp.clip(x, -ACTIVATION_MAX_VAL, ACTIVATION_MAX_VAL)
    a_m = jnp.log(jnp.clip(a_a + MULT_EMU_OFFSET_VAL,
                           MULT_EMU_PRE_MIN_VAL, MULT_EMU_PRE_MAX_VAL))
    za = a_a @ wa
    zm = a_m @ wm
    zm = jnp.exp(jnp.clip(zm, -MULT_EMU_POST_MAX_VAL,
                          MULT_EMU_POST_MAX_VAL)) - MULT_EMU_OFFSET_VAL
    return jnp.concatenate([jnp.maximum(za, 0.0), jnp.maximum(zm, 0.0)], axis=1)
    # TODO(synk): the PyTorch module's NaN check / debug print branch has no
    # kernel equivalent and is intentionally omitted (it is debug-only).


if __name__ == "__main__":
    # Module config: inputFeatures=32, outputFeatures=64, useBias=False,
    # useMultiplicativeUnits=True  -> Wa, Wm are (32, 32).
    batch = 32
    input_features = 32
    output_features = 64
    half = output_features // 2

    key = jax.random.PRNGKey(0)
    kx, kwa, kwm = jax.random.split(key, 3)
    x = jax.random.normal(kx, (batch, input_features), dtype=jnp.float32)
    wa = jax.random.normal(kwa, (input_features, half), dtype=jnp.float32)
    wm = jax.random.normal(kwm, (input_features, half), dtype=jnp.float32)

    # tile_b=8 -> grid=(4,): exercises batch pipelining / TC sharding even at toy size.
    out = layer_additive_multiplicative(x, wa, wm, tile_b=8)
    out = jax.block_until_ready(out)

    ref = _reference_forward(x, wa, wm)
    assert out.shape == (batch, output_features)
    assert jnp.allclose(out, ref, rtol=1e-4, atol=1e-4), "mismatch vs reference"

    print("KERNEL_OK")
</pallas_src>

<mosaic_0001>
module attributes {stable_mosaic.version = 11 : i64} {
  func.func @_additive_multiplicative_kernel(%arg0: i32, %arg1: memref<8x32xf32, #tpu.memory_space<vmem>>, %arg2: memref<32x32xf32, #tpu.memory_space<vmem>>, %arg3: memref<32x32xf32, #tpu.memory_space<vmem>>, %arg4: memref<8x64xf32, #tpu.memory_space<vmem>>) attributes {dimension_semantics = [#tpu.dimension_semantics<parallel>], iteration_bounds = array<i64: 4>, scalar_prefetch = 0 : i64, scratch_operands = 0 : i64, tpu.core_type = #tpu.core_type<tc>, window_params = [{transform_indices = @transform_0, window_bounds = array<i64: 8, 32>}, {pipeline_mode = #tpu.pipeline_mode<synchronous>, transform_indices = @transform_1, window_bounds = array<i64: 32, 32>}, {pipeline_mode = #tpu.pipeline_mode<synchronous>, transform_indices = @transform_2, window_bounds = array<i64: 32, 32>}, {transform_indices = @transform_3, window_bounds = array<i64: 8, 64>}]} {
    %c0 = arith.constant 0 : index
    %c0_0 = arith.constant 0 : index
    %0 = vector.load %arg1[%c0, %c0_0] : memref<8x32xf32, #tpu.memory_space<vmem>>, vector<8x32xf32>
    %cst = arith.constant -1.000000e+01 : f32
    %cst_1 = arith.constant 1.000000e+01 : f32
    %1 = vector.broadcast %cst : f32 to vector<8x32xf32>
    %2 = arith.maximumf %1, %0 : vector<8x32xf32>
    %3 = vector.broadcast %cst_1 : f32 to vector<8x32xf32>
    %4 = arith.minimumf %3, %2 : vector<8x32xf32>
    %cst_2 = arith.constant 1.000000e+00 : f32
    %5 = vector.broadcast %cst_2 : f32 to vector<8x32xf32>
    %6 = arith.addf %4, %5 : vector<8x32xf32>
    %cst_3 = arith.constant 9.99999971E-10 : f32
    %cst_4 = arith.constant 1.000000e+09 : f32
    %7 = vector.broadcast %cst_3 : f32 to vector<8x32xf32>
    %8 = arith.maximumf %7, %6 : vector<8x32xf32>
    %9 = vector.broadcast %cst_4 : f32 to vector<8x32xf32>
    %10 = arith.minimumf %9, %8 : vector<8x32xf32>
    %11 = math.log %10 : vector<8x32xf32>
    %c0_5 = arith.constant 0 : index
    %c0_6 = arith.constant 0 : index
    %12 = vector.load %arg2[%c0_5, %c0_6] : memref<32x32xf32, #tpu.memory_space<vmem>>, vector<32x32xf32>
    %cst_7 = arith.constant dense<0.000000e+00> : vector<8x32xf32>
    %13 = tpu.matmul %4, %12, %cst_7 {dimension_numbers = #tpu.dot_dimension_numbers<[1], [0], [0], [1], [0, 0, 1, 1], [], []>} : vector<8x32xf32>, vector<32x32xf32>, vector<8x32xf32> -> vector<8x32xf32>
    %c0_8 = arith.constant 0 : index
    %c0_9 = arith.constant 0 : index
    %14 = vector.load %arg3[%c0_8, %c0_9] : memref<32x32xf32, #tpu.memory_space<vmem>>, vector<32x32xf32>
    %cst_10 = arith.constant dense<0.000000e+00> : vector<8x32xf32>
    %15 = tpu.matmul %11, %14, %cst_10 {dimension_numbers = #tpu.dot_dimension_numbers<[1], [0], [0], [1], [0, 0, 1, 1], [], []>} : vector<8x32xf32>, vector<32x32xf32>, vector<8x32xf32> -> vector<8x32xf32>
    %cst_11 = arith.constant -2.000000e+01 : f32
    %cst_12 = arith.constant 2.000000e+01 : f32
    %16 = vector.broadcast %cst_11 : f32 to vector<8x32xf32>
    %17 = arith.maximumf %16, %15 : vector<8x32xf32>
    %18 = vector.broadcast %cst_12 : f32 to vector<8x32xf32>
    %19 = arith.minimumf %18, %17 : vector<8x32xf32>
    %20 = math.exp %19 : vector<8x32xf32>
    %cst_13 = arith.constant 1.000000e+00 : f32
    %21 = vector.broadcast %cst_13 : f32 to vector<8x32xf32>
    %22 = arith.subf %20, %21 : vector<8x32xf32>
    %cst_14 = arith.constant 0.000000e+00 : f32
    %23 = vector.broadcast %cst_14 : f32 to vector<8x32xf32>
    %24 = arith.maximumf %13, %23 : vector<8x32xf32>
    %cst_15 = arith.constant 0.000000e+00 : f32
    %25 = vector.broadcast %cst_15 : f32 to vector<8x32xf32>
    %26 = arith.maximumf %22, %25 : vector<8x32xf32>
    %27 = tpu.concatenate %24, %26 in 1 : vector<8x32xf32>, vector<8x32xf32> -> vector<8x64xf32>
    %c0_16 = arith.constant 0 : index
    %c0_17 = arith.constant 0 : index
    %28 = vector.load %arg4[%c0_16, %c0_17] : memref<8x64xf32, #tpu.memory_space<vmem>>, vector<8x64xf32>
    tpu.vector_store %arg4[%c0_16, %c0_17], %27 {strides = array<i32>} : memref<8x64xf32, #tpu.memory_space<vmem>>, vector<8x64xf32>,
    return
  }
  func.func @transform_0(%arg0: i32) -> (i32, i32) {
    %c0_i32 = arith.constant 0 : i32
    %c0_i32_0 = arith.constant 0 : i32
    return %arg0, %c0_i32 : i32, i32
  }
  func.func @transform_1(%arg0: i32) -> (i32, i32) {
    %c0_i32 = arith.constant 0 : i32
    %c0_i32_0 = arith.constant 0 : i32
    %c0_i32_1 = arith.constant 0 : i32
    return %c0_i32, %c0_i32_0 : i32, i32
  }
  func.func @transform_2(%arg0: i32) -> (i32, i32) {
    %c0_i32 = arith.constant 0 : i32
    %c0_i32_0 = arith.constant 0 : i32
    %c0_i32_1 = arith.constant 0 : i32
    return %c0_i32, %c0_i32_0 : i32, i32
  }
  func.func @transform_3(%arg0: i32) -> (i32, i32) {
    %c0_i32 = arith.constant 0 : i32
    %c0_i32_0 = arith.constant 0 : i32
    return %arg0, %c0_i32 : i32, i32
  }
}

</mosaic_0001>

<bundles_post_ra>
// kernel: tpu_custom_call.1
= control target key start
LH: loop header
LB: loop body
LE: loop exit
PB: predicated region body
PF: predicated region fallthrough
CT: control target
= control target key end

     0   :  { %8 = vsyncpa [#allocation3], 0  ;;  %s1052_s0 = inlined_call_operand.hbm [shape: f32[32,32], index: 0, kind: input, shape index: {}]   ;;  %s1053_s1 = inlined_call_operand.hbm [shape: f32[32,32], index: 1, kind: input, shape index: {}]   ;;  %s1054_s2 = inlined_call_operand.hbm [shape: f32[32,32], index: 2, kind: input, shape index: {}]   ;;  %s1055_s3 = inlined_call_operand.hbm [shape: f32[32,64], index: 3, kind: output, shape index: {}]  }
   0x1   :  { %10 = vsyncpa [#allocation3 + $0x1], 0 }
   0x2   :  { %11 = vsyncpa [#allocation6], 0 }
   0x3   :  { %12 = vsyncpa [#allocation4], 0 }
   0x4   :  { %14 = vsyncpa [#allocation4 + $0x1], 0  ;;  %s825_s12 = smov 0   ;;  %s827_s13 = smov 0  }
   0x5   :  { %s829_s14 = smov 0   ;;  %s831_s15 = smov 0  }
   0x6 LB: > { %s846_s16 = sadd.s32 4294967295, %s793_s15   ;;  %s495_s17 = sadd.s32 4294967294, %s793_s15   ;;  %s793_s15 = sphi %s831_s15, %s1074_s15   ;;  %s789_s14 = sphi %s829_s14, %s1073_s14   ;;  %s785_s13 = sphi %s827_s13, %s1072_s13   ;;  %s781_s12 = sphi %s825_s12, %s1071_s12  }
   0x7   : > { %p40_p0 = scmp.ne.s32.totalorder %s785_s13, %s781_s12  ;;  %p1056_p1 = scmp.eq.s32.totalorder %s846_s16, 0 }
   0x8   : > { %p112_p3 = scmp.eq.s32.totalorder %s495_s17, 3  ;;  %p496_p5 = scmp.ge.s32.totalorder %s793_s15, 1 }
   0x9   : > { %p855_p4 = por %p1056_p1, %p40_p0  ;;  %p119_p7 = scmp.lt.s32.totalorder %s793_s15, 5 }
   0xa   : > { %p860_p6 = por %p112_p3, %p40_p0  ;;  %s795_s21 = smov [#allocation5]  }
   0xb   : > { %s1059_s18 = scalar_select %p855_p4, 1, 0 }
   0xc   : > { %s1060_s19 = scalar_select %p860_p6, 1, 0 }
   0xd   : > { %p865_p8 = pnand %p496_p5, %p119_p7  ;;  %s131_s22 = sshll.u32 %s795_s21, 4  ;;  %s132_s22 = int_to_ptr.vmem [resolvable:$true] %s131_s22 }
   0xe   : > { %s796_s24 = smov [#allocation7]   ;;  %s637_s28 = scalar_lea.hbm %s1053_s1, 512 }
   0xf   : > { %s1061_s20 = scalar_select %p865_p8, 1, 0 }
  0x10   : > { %p572_p9 = pneg %p865_p8  ;;  %s144_s25 = sshll.u32 %s796_s24, 4  ;;  %s877_s25 = int_to_ptr.vmem [resolvable:$true] %s144_s25 }
  0x11   : > { %p638_p11 = scmp.ne.s32.totalorder %s1053_s1, %s637_s28  ;;  %p644_p3 = scmp.lt.u32.totalorder %s637_s28, %s1053_s1 }
  0x12   : > { %p873_p10 = pnand %p572_p9, %p1056_p1 }
  0x14   : > { %p639_p12 = pneg %p873_p10 }
  0x16   : > { %p640_p13 = pnand %p639_p12, %p638_p11 }
  0x18   : > { %p641_p0 = pneg %p640_p13 }
  0x1a   : > { %p646_p5 = pnand %p644_p3, %p641_p0 }
  0x1c   : > { %649 = shalt.err (!%p646_p5)
}
  0x1d   : > { %s650_s6 = scalar_lea.vmem %s132_s22, 512  ;;  %p658_p2 = scmp.lt.s32.totalorder %s132_s22, %s132_s22 }
  0x1e   : > { %p651_p7 = scmp.ne.s32.totalorder %s132_s22, %s650_s6  ;;  %p659_p6 = scmp.lt.s32.totalorder %s650_s6, %s650_s6 }
  0x20   : > { %p653_p9 = pnand %p651_p7, %p639_p12  ;;  %p660_p4 = por %p659_p6, %p658_p2 }
  0x22   : > { %p654_p1 = pneg %p653_p9 }
  0x24   : > { %p661_p8 = pnand %p660_p4, %p654_p1 }
  0x26   : > { %664 = shalt.err (!%p661_p8)
}
  0x27   : > { %s797_s7 = smov 128   ;;  %s798_s8 = smov 8  }
  0x28   : > { %575 = dma.hbm_to_vmem [thread:$0]  (!%p873_p10), %s1053_s1, 512, %s132_s22, [#allocation6], %s797_s7, %s797_s7, %s798_s8  }
  0x29   : > { %s665_s21 = scalar_lea.hbm %s1054_s2, 512 }
  0x2a   : > { %p666_p11 = scmp.ne.s32.totalorder %s1054_s2, %s665_s21  ;;  %p672_p4 = scmp.lt.u32.totalorder %s665_s21, %s1054_s2 }
  0x2c   : > { %p668_p1 = pnand %p666_p11, %p639_p12 }
  0x2e   : > { %p669_p2 = pneg %p668_p1 }
  0x30   : > { %p674_p6 = pnand %p672_p4, %p669_p2 }
  0x32   : > { %677 = shalt.err (!%p674_p6)
}
  0x33   : > { %s678_s22 = scalar_lea.vmem %s877_s25, 512  ;;  %p686_p3 = scmp.lt.s32.totalorder %s877_s25, %s877_s25 }
  0x34   : > { %p679_p8 = scmp.ne.s32.totalorder %s877_s25, %s678_s22  ;;  %p687_p5 = scmp.lt.s32.totalorder %s678_s22, %s678_s22 }
  0x36   : > { %p681_p13 = pnand %p679_p8, %p639_p12  ;;  %p688_p7 = por %p687_p5, %p686_p3 }
  0x38   : > { %p682_p0 = pneg %p681_p13 }
  0x3a   : > { %p689_p9 = pnand %p688_p7, %p682_p0 }
  0x3c   : > { %692 = shalt.err (!%p689_p9)
}
  0x3d   : > { %578 = dma.hbm_to_vmem [thread:$0]  (!%p873_p10), %s1054_s2, 512, %s877_s25, [#allocation6], %s797_s7, %s797_s7, %s798_s8  }
  0x3e   : > { %s927_s4 = sadd.s32 1, %s793_s15   ;;  %s27_s23 = sadd.s32 1, %s789_s14 }
  0x3f   : > { %s24_s5 = ssub.s32 %s793_s15, %s927_s4  ;;  %p34_p12 = scmp.ne.s32.totalorder %s789_s14, %s785_s13 }
  0x40   : > { %p25_p11 = scmp.eq.s32.totalorder %s24_s5, 0  ;;  %p35_p1 = scmp.eq.s32.totalorder %s793_s15, 0 }
  0x41   : > { %p1063_p2 = scmp.eq.s32.totalorder %s846_s16, 3  ;;  %p589_p6 = scmp.lt.s32.totalorder %s793_s15, 4 }
  0x42   : > { %s943_s9 = scalar_select %p25_p11, %s789_s14, %s27_s23  }
  0x43   : > { %p937_p4 = por %p1063_p2, %p34_p12  ;;  %p36_p8 = por %p35_p1, %p34_p12 }
  0x44   : > { %s158_s10 = sand.u32 1, %s789_s14   ;;  %s501_s25 = sshll.u32 %s793_s15, 7 }
  0x45   : > { %s500_s11 = sshll.u32 %s158_s10, 3  ;;  %s950_s17 = scalar_lea.hbm %s1052_s0, %s501_s25 }
  0x46   : > { %s162_s21 = scalar_lea.vmem [#allocation2], %s500_s11  ;;  %p954_p10 = pnand %p589_p6, %p36_p8 }
  0x47   : > { %s169_s24 = sshll.u32 %s162_s21, 4  ;;  %s159_s27 = scalar_lea.sflag [#allocation3], %s158_s10  ;;  %s952_s24 = int_to_ptr.vmem [resolvable:$true] %s169_s24 }
  0x48   : > { %s693_s28 = scalar_lea.hbm %s950_s17, 128  ;;  %p695_p0 = pneg %p954_p10 }
  0x49   : > { %p694_p13 = scmp.ne.s32.totalorder %s950_s17, %s693_s28  ;;  %s698_s30 = scalar_lea.hbm %s1052_s0, 512 }
  0x4a   : > { %p699_p7 = scmp.lt.u32.totalorder %s950_s17, %s1052_s0  ;;  %p700_p9 = scmp.lt.u32.totalorder %s698_s30, %s693_s28 }
  0x4b   : > { %p696_p3 = pnand %p695_p0, %p694_p13  ;;  %p702_p11 = scmp.lt.u32.totalorder %s693_s28, %s950_s17 }
  0x4c   : > { %p701_p12 = por %p700_p9, %p699_p7 }
  0x4d   : > { %p697_p5 = pneg %p696_p3 }
  0x4e   : > { %p703_p1 = por %p702_p11, %p701_p12 }
  0x50   : > { %p704_p2 = pnand %p703_p1, %p697_p5 }
  0x52   : > { %707 = shalt.err (!%p704_p2)
}
  0x53   : > { %s708_s10 = scalar_lea.vmem %s952_s24, 128  ;;  %s799_s11 = smov [#allocation2]  }
  0x54   : > { %p709_p6 = scmp.ne.s32.totalorder %s952_s24, %s708_s10  ;;  %s713_s25 = sshll.u32 %s799_s11, 4  ;;  %s714_s25 = int_to_ptr.vmem [resolvable:$false] %s713_s25 }
  0x55   : > { %s715_s7 = scalar_lea.vmem %s714_s25, 256  ;;  %p716_p3 = scmp.lt.s32.totalorder %s952_s24, %s714_s25 }
  0x56   : > { %p711_p8 = pnand %p709_p6, %p695_p0  ;;  %p717_p7 = scmp.lt.s32.totalorder %s715_s7, %s708_s10 }
  0x58   : > { %p712_p13 = pneg %p711_p8  ;;  %p718_p9 = por %p717_p7, %p716_p3 }
  0x5a   : > { %p719_p12 = pnand %p718_p9, %p712_p13 }
  0x5c   : > { %722 = shalt.err (!%p719_p12)
}
  0x5d   : > { %582 = dma.hbm_to_vmem [thread:$0]  (!%p954_p10), %s950_s17, 128, %s952_s24, %s159_s27  }
  0x5e   : > { %p1066_p5 = scmp.ne.s32.totalorder %s1061_s20, 0 }
  0x5f   : > { %s986_s8 = sand.u32 (!%p1066_p5), 1, %s785_s13   ;;  %p1067_p0 = scmp.ne.s32.totalorder (!%p1066_p5), %s1059_s18, 0 }
  0x60   : > { %178 = sbr.rel (%p1066_p5) target bundleno = 492 (0x1ec), region = 32  ;;  %s503_s21 = sshll.u32 (!%p1066_p5), %s986_s8, 3 }
  0x61   : > { %s181_s28 = scalar_lea.sflag (!%p1066_p5), [#allocation3], %s986_s8  ;;  %s184_s22 = scalar_lea.vmem (!%p1066_p5), [#allocation2], %s503_s21 }
  0x67   : > { %768 = dma.done.wait (%p1067_p0), %s181_s28, 128  }
  0x68   : > { %770 = vsyncadd (%p1067_p0), %s181_s28, 4294967168  ;;  %p1068_p10 = scmp.eq.s32.totalorder %s846_s16, 0 }
  0x6a   : > { %772 = dma.done.wait (%p1068_p10), [#allocation6], 1024   ;;  %p1069_p11 = pmov %p1068_p10 }
  0x6b   : > { %v800_v0 = vmov 0.0|0.0   ;;  %vm801_vm0 = vmmov 0   ;;  %v802_v1 = vmov 0.0   ;;  %v301_v2 = vld [vmem:[#allocation7] sm:$0xff]  ;;  %v302_v3 = vld [vmem:[#allocation7 + $0x8] sm:$0xff]  ;;  %v303_v4 = vld [vmem:[#allocation7 + $0x10] sm:$0xff] }
  0x6c   : > { %774 = vsyncadd (%p1069_p11), [#allocation6], 4294966272  ;;  %554 = vmatprep.subr.bf16.mxu1 %v800_v0  ;;  %545 = vmatprep.mubr.msk.f32.mxu1 %vm801_vm0, %v802_v1  ;;  %v555_v5 = vpack.c.bf16 %v302_v3, %v301_v2  ;;  %v304_v6 = vld [vmem:[#allocation7 + $0x18] sm:$0xff]  ;;  %v223_v8 = vld [vmem:[#allocation5] sm:$0xff]  ;;  %vm227_vm1 = vcmask 261120   ;;  %s803_s18 = smov 32  }
  0x6d   : > { %548 = vmatprep.subr.bf16.mxu0 %v800_v0  ;;  %534 = vmatprep.mubr.msk.f32.mxu0 %vm801_vm0, %v802_v1  ;;  %v215_v7 = vld [vmem:[%s184_s22] sm:$0xff]  ;;  %v224_v10 = vld [vmem:[#allocation5 + $0x8] sm:$0xff]  ;;  %v558_v13 = vpack.c.bf16 %v304_v6, %v303_v4  ;;  %s513_s20 = sshll.u32 %s846_s16, 7  ;;  %s214_s17 = scalar_lea.vmem [#allocation8], %s503_s21  ;;  %vm390_vm2 = vcmask 523264  }
  0x6e   : > { %v507_v9 = vclamps-f32 %v215_v7, 10.0  ;;  %v225_v11 = vld [vmem:[#allocation5 + $0x10] sm:$0xff]  ;;  %v226_v12 = vld [vmem:[#allocation5 + $0x18] sm:$0xff]  ;;  %556 = vmatpush3.bf16.msra.mxu1 %v555_v5  ;;  %v549_v14 = vpack.c.bf16 %v224_v10, %v223_v8  ;;  %s406_s24 = sshll.u32 %s214_s17, 4  ;;  %s1008_s29 = scalar_lea.hbm %s1055_s3, %s513_s20  ;;  %s1010_s24 = int_to_ptr.vmem [resolvable:$true] %s406_s24 }
  0x6f   : > { %557 = vmatprep.subr.bf16.mxu1 %v800_v0  ;;  %v552_v16 = vpack.c.bf16 %v226_v12, %v225_v11  ;;  %s393_s30 = scalar_lea.sflag [#allocation4], %s986_s8  ;;  %s723_s16 = scalar_lea.vmem %s1010_s24, 128 }
  0x70   : > { %v218_v15 = vadd.f32 1.0, %v507_v9  ;;  %550 = vmatpush3.bf16.msra.mxu0 %v549_v14  ;;  %p724_p1 = scmp.ne.s32.totalorder %s1010_s24, %s723_s16  ;;  %s804_s23 = smov [#allocation8]  }
  0x71   : > { %551 = vmatprep.subr.bf16.mxu0 %v800_v0  ;;  %s727_s5 = sshll.u32 %s804_s23, 4  ;;  %s728_s5 = int_to_ptr.vmem [resolvable:$false] %s727_s5 }
  0x72   : > { %v219_v17 = vmax.f32 %v218_v15, 1e-09  ;;  %559 = vmatpush3.bf16.msra.mxu1 %v558_v13  ;;  %p725_p2 = pnand %p724_p1, %p937_p4  ;;  %s729_s10 = scalar_lea.vmem %s728_s5, 256 }
  0x73   : > { %p730_p8 = scmp.lt.s32.totalorder %s1010_s24, %s728_s5  ;;  %p731_p13 = scmp.lt.s32.totalorder %s729_s10, %s723_s16 }
  0x74   : > { %v220_v18 = vmin.f32 %v219_v17, 1e+09  ;;  %553 = vmatpush3.bf16.msra.mxu0 %v552_v16  ;;  %p726_p6 = pneg %p725_p2 }
  0x75   : > { %p732_p3 = por %p731_p13, %p730_p8 }
  0x76   : > { %633 = vlog2.f32 %v220_v18 }
  0x77   : > { %535 = vmatmul.mubr.msk.f32.vlgmr.msra.gmra.mrb[0].mxu0 %vm227_vm1, %v507_v9  ;;  %p733_p7 = pnand %p732_p3, %p726_p6 }
  0x80   : > { %v634_v19 = vpop.eup %633 }
  0x81   : > { %v222_v20 = vmul.f32 0.6931472, %v634_v19 }
  0x83   : > { %546 = vmatmul.mubr.msk.f32.vlgmr.msra.gmra.mrb[0].mxu1 %vm227_vm1, %v222_v20 }
 0x14a   : > { %v297_v21 = vpop.f32.mrb[0].mxu0 }
 0x14b   : > { %v536_v22 = vpop.f32.mrb[1].mxu0  ;;  %v383_v30 = vmax.f32 %v297_v21, 0.0 }
 0x156   : > { %v374_v23 = vpop.f32.mrb[0].mxu1 }
 0x157   : > { %v510_v24 = vclamps-f32 %v374_v23, 20.0  ;;  %v547_v25 = vpop.f32.mrb[1].mxu1 }
 0x159   : > { %v380_v26 = vmul.f32 1.442695, %v510_v24 }
 0x15b   : > { %635 = vpow2.f32 %v380_v26 }
 0x165   : > { %v636_v27 = vpop.eup %635 }
 0x166   : > { %v511_v28 = vadd.f32 -1.0, %v636_v27 }
 0x168   : > { %v384_v29 = vmax.f32 %v511_v28, 0.0 }
 0x16a   : > { %386 = vrot.lane.b32.xlu0 %v384_v29, %s803_s18 }
 0x1dc   : > { %v387_v31 = vpop.permute.xlu0 %386 }
 0x1dd   : > { %v389_v32 = vsel %vm227_vm1, %v383_v30, %v387_v31 }
 0x1de   : > { %391 = vst.msk [vmem:[%s214_s17] sm:$0xff] %vm390_vm2, %v389_v32 }
 0x1df   : > { %736 = shalt.err (!%p733_p7)
}
 0x1e0   : > { %s737_s11 = scalar_lea.hbm %s1008_s29, 128  ;;  %s741_s8 = scalar_lea.hbm %s1055_s3, 512 }
 0x1e1   : > { %p738_p9 = scmp.ne.s32.totalorder %s1008_s29, %s737_s11  ;;  %p742_p0 = scmp.lt.u32.totalorder %s1008_s29, %s1055_s3 }
 0x1e2   : > { %p743_p10 = scmp.lt.u32.totalorder %s741_s8, %s737_s11  ;;  %p745_p1 = scmp.lt.u32.totalorder %s737_s11, %s1008_s29 }
 0x1e3   : > { %p739_p12 = pnand %p738_p9, %p937_p4 }
 0x1e4   : > { %p744_p11 = por %p743_p10, %p742_p0 }
 0x1e5   : > { %p740_p5 = pneg %p739_p12 }
 0x1e6   : > { %p746_p2 = por %p745_p1, %p744_p11 }
 0x1e8   : > { %p747_p6 = pnand %p746_p2, %p740_p5 }
 0x1ea   : > { %750 = shalt.err (!%p747_p6)
}
 0x1eb   : > { %570 = dma.vmem_to_hbm [thread:$0]  (%p937_p4), %s1010_s24, 128, %s1008_s29, %s393_s30  }
 0x1ec PF: > { %p592_p8 = scmp.ge.s32.totalorder %s793_s15, 2  ;;  %s418_s22 = sand.u32 1, %s781_s12  }
 0x1ed   : > { %p1070_p13 = scmp.ne.s32.totalorder %s1060_s19, 0  ;;  %s419_s18 = scalar_lea.sflag [#allocation4], %s418_s22 }
 0x1ef   : > { %p584_p3 = pnand %p592_p8, %p1070_p13 }
 0x1f1   : > { %776 = dma.done.wait (!%p584_p3), %s419_s18, 128  }
 0x1f2   : > { %778 = vsyncadd (!%p584_p3), %s419_s18, 4294967168  ;;  %p17_p7 = scmp.ge.s32.totalorder %s927_s4, 6   ;;  %s1071_s12 = smov %s785_s13 }
 0x1f3   : > { %s1072_s13 = smov %s789_s14  ;;  %s1073_s14 = smov %s943_s9 }
 0x1f4   : > { %s1074_s15 = smov %s927_s4  ;;  %19 = sbr.rel (!%p17_p7) target bundleno = 6 (0x6), region = 85 }
 0x1fb   :  { %424 = vsyncpa [#allocation3], 1 }
 0x1fc   :  { %426 = vsyncpa [#allocation3 + $0x1], 1 }
 0x1fd   :  { %427 = vsyncpa [#allocation6], 1 }
 0x1fe   :  { %428 = vsyncpa [#allocation4], 1 }
 0x1ff   :  { %430 = vsyncpa [#allocation4 + $0x1], 1 }

</bundles_post_ra>
